<compile_context>
chip_gen: v7x
topology: tpu7x:2x2x1
jax: 0.10.0
libtpu: 0.0.40
codegen_flags: <defaults>
</compile_context>

<pallas_src>
import jax
import jax.numpy as jnp
from jax.experimental import pallas as pl
from jax.experimental.pallas import tpu as pltpu


def aconc_fc_kernel(params_ref, x_ref, o_ref):
    # params_ref: SMEM (3,) float32 -> [p2, scale (= p1 - p2), beta * scale]
    x = x_ref[...]
    p2 = params_ref[0].astype(x.dtype)
    scale = params_ref[1].astype(x.dtype)
    beta_scale = params_ref[2].astype(x.dtype)

    # Exact sigmoid with a single EUP push: sigmoid(z) = 0.5 + 0.5*tanh(z/2).
    # Keep all math in x.dtype (native bf16 path on v6e/v7x; f32 inputs stay f32).
    z = beta_scale * x
    sig = 0.5 + 0.5 * jnp.tanh(0.5 * z)

    # Fused output algebra: (p1-p2)*x*sig + p2*x == x * (scale*sig + p2).
    o_ref[...] = (x * (scale * sig + p2)).astype(o_ref.dtype)


def aconc_fc(x, p1, p2, beta, *, tile_rows=512, tile_cols=2048,
             fast_path_bytes=4 * 1024 * 1024, donate_x=False):
    """ACON-C activation. x: (B, F). p1/p2/beta: scalars (or (1,1) params)."""
    assert x.ndim == 2, "AconC_FC expects a 2-D (batch, features) input"
    orig_shape = x.shape
    itemsize = jnp.dtype(x.dtype).itemsize

    # Fold the algebra on the host; parameters live as three f32 SMEM scalars.
    p1 = jnp.asarray(p1, jnp.float32).reshape(())
    p2 = jnp.asarray(p2, jnp.float32).reshape(())
    beta = jnp.asarray(beta, jnp.float32).reshape(())
    scale = p1 - p2
    params = jnp.stack([p2, scale, beta * scale]).astype(jnp.float32)

    # Lane-dense wrapper reshape: elementwise op, so layout is free to change.
    # A non-128-multiple last dim forces masked partial stores on every tile;
    # re-slab the array when the flattened size allows it.
    B, F = x.shape
    reshaped = False
    if F % 128 != 0 and (B * F) % 128 == 0:
        cols = 128
        while (B * F) % (cols * 2) == 0 and cols * 2 <= tile_cols:
            cols *= 2
        x = x.reshape((B * F) // cols, cols)
        B, F = x.shape
        reshaped = True

    total_bytes = B * F * itemsize
    n_elems = B * F
    cost = pl.CostEstimate(flops=5 * n_elems, transcendentals=n_elems,
                           bytes_accessed=2 * total_bytes)
    aliases = {1: 0} if donate_x else {}   # x (input index 1) -> output 0

    # ---- Small-input fast path: gated on BYTES, never on caller tile sizes.
    if total_bytes <= fast_path_bytes:
        out = pl.pallas_call(
            aconc_fc_kernel,
            out_shape=jax.ShapeDtypeStruct((B, F), x.dtype),
            in_specs=[
                pl.BlockSpec(memory_space=pltpu.SMEM),              # params
                pl.BlockSpec(memory_space=pltpu.MemorySpace.VMEM),  # x (whole)
            ],
            out_specs=pl.BlockSpec(memory_space=pltpu.MemorySpace.VMEM),
            compiler_params=pltpu.CompilerParams(
                vmem_limit_bytes=int(2 * total_bytes + (8 << 20)),
            ),
            cost_estimate=cost,
            input_output_aliases=aliases,
        )(params, x)
        return out.reshape(orig_shape) if reshaped else out

    # ---- General path: 2-D grid of large lane-dense tiles, auto-pipelined.
    min_sub = max(8, 32 // itemsize)          # f32: 8, bf16: 16, int8/fp8: 32
    tr = min(tile_rows, B)
    tf = min(tile_cols, F)
    if tr < B:
        tr = max(min_sub, (tr // min_sub) * min_sub)
    if tf < F:
        tf = max(128, (tf // 128) * 128)      # lane-dense output stores
    grid = (pl.cdiv(B, tr), pl.cdiv(F, tf))

    # VMEM budget derived from the tiles: double-buffered (in + out) + slack,
    # capped safely below v7x's 64 MiB physical VMEM.
    tile_bytes = tr * tf * itemsize
    vmem_limit = min(int(2 * 2 * tile_bytes + (8 << 20)), 48 << 20)

    out = pl.pallas_call(
        aconc_fc_kernel,
        out_shape=jax.ShapeDtypeStruct((B, F), x.dtype),
        grid_spec=pltpu.PrefetchScalarGridSpec(
            # params go via scalar prefetch -> a single SMEM copy, never
            # treated as a per-step pipelined operand.
            num_scalar_prefetch=1,
            grid=grid,
            in_specs=[pl.BlockSpec((tr, tf), lambda i, j, params: (i, j))],
            out_specs=pl.BlockSpec((tr, tf), lambda i, j, params: (i, j)),
        ),
        compiler_params=pltpu.CompilerParams(
            # Both axes parallel -> megacore/v7x 2-TC sharding of the grid.
            dimension_semantics=("parallel", "parallel"),
            vmem_limit_bytes=vmem_limit,
        ),
        cost_estimate=cost,
        input_output_aliases=aliases,
    )(params, x)
    return out.reshape(orig_shape) if reshaped else out


def aconc_fc_ref(x, p1, p2, beta):
    d = p1 * x - p2 * x
    return d * jax.nn.sigmoid(beta * d) + p2 * x


if __name__ == "__main__":
    key = jax.random.PRNGKey(0)
    kx1, kx2, kx3, kp1, kp2 = jax.random.split(key, 5)

    # Deterministic parameter init mirroring the module:
    #   p1 = randn(1,1), p2 = randn(1,1), beta = ones(1,1)
    p1 = float(jax.random.normal(kp1, ()))
    p2 = float(jax.random.normal(kp2, ()))
    beta = 1.0

    cases = []
    # 1) Small FC input (batch=16, hidden=128) -> whole-array fast path.
    x1 = jax.random.normal(kx1, (16, 128), dtype=jnp.float32)
    cases.append((x1, {}))
    # 2) Force the tiled / scalar-prefetch grid path with small test tiles:
    #    grid = (4, 2) (even step count -> balanced across v7x's 2 TCs),
    #    includes a partial last row block.
    x2 = jax.random.normal(kx2, (200, 256), dtype=jnp.float32)
    cases.append((x2, dict(tile_rows=64, tile_cols=128, fast_path_bytes=0)))
    # 3) Non-128-multiple feature dim -> lane-dense wrapper reshape path.
    x3 = jax.random.normal(kx3, (32, 100), dtype=jnp.float32)
    cases.append((x3, {}))

    for x, kw in cases:
        y = jax.block_until_ready(aconc_fc(x, p1, p2, beta, **kw))
        y_ref = aconc_fc_ref(x, p1, p2, beta)
        assert y.shape == x.shape and y.dtype == x.dtype
        # Exact sigmoid (tanh form) -> tight tolerance vs the reference.
        assert jnp.allclose(y, y_ref, atol=1e-5, rtol=1e-5), "mismatch vs reference"

    print("KERNEL_OK")
</pallas_src>

<mosaic_0001>
module attributes {stable_mosaic.version = 11 : i64} {
  func.func @aconc_fc_kernel(%arg0: memref<3xf32, #tpu.memory_space<smem>>, %arg1: memref<16x128xf32, #tpu.memory_space<vmem>>, %arg2: memref<16x128xf32, #tpu.memory_space<vmem>>) attributes {dimension_semantics = [], scalar_prefetch = 0 : i64, scratch_operands = 0 : i64, tpu.core_type = #tpu.core_type<tc>} {
    %c0 = arith.constant 0 : index
    %c0_0 = arith.constant 0 : index
    %0 = vector.load %arg1[%c0, %c0_0] : memref<16x128xf32, #tpu.memory_space<vmem>>, vector<16x128xf32>
    %c0_1 = arith.constant 0 : index
    %1 = memref.load %arg0[%c0_1] : memref<3xf32, #tpu.memory_space<smem>>
    %c1 = arith.constant 1 : index
    %2 = memref.load %arg0[%c1] : memref<3xf32, #tpu.memory_space<smem>>
    %c2 = arith.constant 2 : index
    %3 = memref.load %arg0[%c2] : memref<3xf32, #tpu.memory_space<smem>>
    %4 = vector.broadcast %3 : f32 to vector<16x128xf32>
    %5 = arith.mulf %4, %0 : vector<16x128xf32>
    %cst = arith.constant 5.000000e-01 : f32
    %6 = vector.broadcast %cst : f32 to vector<16x128xf32>
    %7 = arith.mulf %6, %5 : vector<16x128xf32>
    %8 = math.tanh %7 : vector<16x128xf32>
    %cst_2 = arith.constant 5.000000e-01 : f32
    %9 = vector.broadcast %cst_2 : f32 to vector<16x128xf32>
    %10 = arith.mulf %9, %8 : vector<16x128xf32>
    %cst_3 = arith.constant 5.000000e-01 : f32
    %11 = vector.broadcast %cst_3 : f32 to vector<16x128xf32>
    %12 = arith.addf %11, %10 : vector<16x128xf32>
    %13 = vector.broadcast %2 : f32 to vector<16x128xf32>
    %14 = arith.mulf %13, %12 : vector<16x128xf32>
    %15 = vector.broadcast %1 : f32 to vector<16x128xf32>
    %16 = arith.addf %14, %15 : vector<16x128xf32>
    %17 = arith.mulf %0, %16 : vector<16x128xf32>
    %c0_4 = arith.constant 0 : index
    %c0_5 = arith.constant 0 : index
    %18 = vector.load %arg2[%c0_4, %c0_5] : memref<16x128xf32, #tpu.memory_space<vmem>>, vector<16x128xf32>
    tpu.vector_store %arg2[%c0_4, %c0_5], %17 {strides = array<i32>} : memref<16x128xf32, #tpu.memory_space<vmem>>, vector<16x128xf32>,
    return
  }
}

</mosaic_0001>

<bundles_post_ra>
// kernel: tpu_custom_call.1
= control target key start
LH: loop header
LB: loop body
LE: loop exit
PB: predicated region body
PF: predicated region fallthrough
CT: control target
= control target key end

     0   :  { %7 = vsyncpa [#allocation5], 0  ;;  %s214_s0 = inlined_call_operand.hbm [shape: f32[3], index: 0, kind: input, shape index: {}]   ;;  %s215_s1 = inlined_call_operand.hbm [shape: f32[16,128], index: 1, kind: input, shape index: {}]   ;;  %s216_s2 = inlined_call_operand.hbm [shape: f32[16,128], index: 2, kind: output, shape index: {}]  }
   0x1   :  { %8 = vsyncpa [#allocation3], 0 }
   0x2   :  { %9 = vsyncpa [#allocation4], 0  ;;  %s92_s11 = scalar_lea.hbm %s214_s0, 16 }
   0x3   :  { %p93_p0 = scmp.ne.s32.totalorder %s214_s0, %s92_s11  ;;  %p96_p1 = scmp.lt.u32.totalorder %s92_s11, %s214_s0 }
   0x5   :  { %p98_p2 = pnand %p96_p1, %p93_p0 }
   0x7   :  { %101 = shalt.err (!%p98_p2)
}
   0x8   :  { %s152_s16 = smov [#allocation2]   ;;  %s153_s19 = smov [#allocation6]  }
   0x9   :  { %17 = dma.hbm_to_smem %s214_s0, 16, %s152_s16, [#allocation5]  }
   0xa   :  { %s23_s20 = sshll.u32 %s153_s19, 4  ;;  %s102_s23 = scalar_lea.hbm %s215_s1, 256  ;;  %s24_s20 = int_to_ptr.vmem [resolvable:$true] %s23_s20 }
   0xb   :  { %p103_p3 = scmp.ne.s32.totalorder %s215_s1, %s102_s23  ;;  %p106_p4 = scmp.lt.u32.totalorder %s102_s23, %s215_s1 }
   0xd   :  { %p108_p5 = pnand %p106_p4, %p103_p3 }
   0xf   :  { %111 = shalt.err (!%p108_p5)
}
  0x10   :  { %s112_s28 = scalar_lea.vmem %s24_s20, 256  ;;  %p117_p7 = scmp.lt.s32.totalorder %s24_s20, %s24_s20 }
  0x11   :  { %p113_p6 = scmp.ne.s32.totalorder %s24_s20, %s112_s28  ;;  %p118_p8 = scmp.lt.s32.totalorder %s112_s28, %s112_s28 }
  0x13   :  { %p119_p9 = por %p118_p8, %p117_p7 }
  0x15   :  { %p120_p10 = pnand %p119_p9, %p113_p6 }
  0x17   :  { %123 = shalt.err (!%p120_p10)
}
  0x18   :  { %s154_s0 = smov 128   ;;  %s155_s29 = smov 8  }
  0x19   :  { %29 = dma.hbm_to_vmem [thread:$0]  %s215_s1, 256, %s24_s20, [#allocation3], %s154_s0, %s154_s0, %s155_s29  }
  0x1a   :  { %146 = dma.done.wait [#allocation5], 16  }
  0x1b   :  { %147 = vsyncadd [#allocation5], 4294967280 }
  0x1c   :  { %148 = dma.done.wait [#allocation3], 256  }
  0x1d   :  { %149 = vsyncadd [#allocation3], 4294967040 }
  0x1e   :  { %36 = sfence }
  0x1f   :  { %s82_s4 = sld [smem:[#allocation2 + $0x2]]  ;;  %v37_v0 = vld [vmem:[#allocation6] sm:$0xff]  ;;  %v38_v1 = vld [vmem:[#allocation6 + $0x8] sm:$0xff]  ;;  %s81_s5 = sld [smem:[#allocation2 + $0x1]] }
  0x20   :  { %s39_s6 = sld [smem:[#allocation2]]  ;;  %s156_s1 = smov [#allocation7]  }
  0x21   :  { %s68_s7 = sshll.u32 %s156_s1, 4  ;;  %s69_s7 = int_to_ptr.vmem [resolvable:$true] %s68_s7 }
  0x22   :  { %s124_s8 = scalar_lea.vmem %s69_s7, 256  ;;  %p129_p12 = scmp.lt.s32.totalorder %s69_s7, %s69_s7 }
  0x23   :  { %p125_p11 = scmp.ne.s32.totalorder %s69_s7, %s124_s8  ;;  %p130_p13 = scmp.lt.s32.totalorder %s124_s8, %s124_s8 }
  0x25   :  { %v42_v2 = vstv %s82_s4  ;;  %v53_v10 = vstv %s81_s5  ;;  %p131_p0 = por %p130_p13, %p129_p12 }
  0x26   :  { %v43_v3 = vmul.f32 %v42_v2, %v37_v0  ;;  %v44_v4 = vmul.f32 %v42_v2, %v38_v1  ;;  %v56_v13 = vstv %s39_s6 }
  0x27   :  { %p132_p1 = pnand %p131_p0, %p125_p11 }
  0x28   :  { %v45_v5 = vmul.f32 0.5, %v43_v3  ;;  %v46_v6 = vmul.f32 0.5, %v44_v4 }
  0x2a   :  { %88 = vtanh.f32 %v45_v5 }
  0x2b   :  { %90 = vtanh.f32 %v46_v6 }
  0x34   :  { %v89_v7 = vpop.eup %88 }
  0x35   :  { %v91_v8 = vpop.eup %90  ;;  %v49_v9 = vmul.f32 0.5, %v89_v7 }
  0x36   :  { %v50_v11 = vmul.f32 0.5, %v91_v8 }
  0x37   :  { %v51_v12 = vadd.f32 0.5, %v49_v9 }
  0x38   :  { %v52_v14 = vadd.f32 0.5, %v50_v11 }
  0x39   :  { %v54_v15 = vmul.f32 %v53_v10, %v51_v12 }
  0x3a   :  { %v55_v16 = vmul.f32 %v53_v10, %v52_v14 }
  0x3b   :  { %v57_v17 = vadd.f32 %v56_v13, %v54_v15 }
  0x3c   :  { %v58_v18 = vadd.f32 %v56_v13, %v55_v16 }
  0x3d   :  { %v59_v19 = vmul.f32 %v57_v17, %v37_v0 }
  0x3e   :  { %v60_v20 = vmul.f32 %v58_v18, %v38_v1 }
  0x3f   :  { %61 = vst [vmem:[#allocation7] sm:$0xff] %v59_v19 }
  0x40   :  { %62 = vst [vmem:[#allocation7 + $0x8] sm:$0xff] %v60_v20 }
  0x41   :  { %135 = shalt.err (!%p132_p1)
}
  0x42   :  { %s136_s11 = scalar_lea.hbm %s216_s2, 256 }
  0x43   :  { %p137_p2 = scmp.ne.s32.totalorder %s216_s2, %s136_s11  ;;  %p140_p3 = scmp.lt.u32.totalorder %s136_s11, %s216_s2 }
  0x45   :  { %p142_p4 = pnand %p140_p3, %p137_p2 }
  0x47   :  { %145 = shalt.err (!%p142_p4)
}
  0x48   :  { %74 = dma.vmem_to_hbm [thread:$0]  %s69_s7, 256, %s216_s2, [#allocation4], %s154_s0, %s154_s0, %s155_s29  }
  0x49   :  { %150 = dma.done.wait [#allocation4], 256  }
  0x4a   :  { %151 = vsyncadd [#allocation4], 4294967040 }
  0x4b   :  { %78 = vsyncpa [#allocation3], 1 }
  0x4c   :  { %79 = vsyncpa [#allocation4], 1 }
  0x4d   :  { %80 = vsyncpa [#allocation5], 1 }

</bundles_post_ra>
